<compile_context>
chip_gen: v5e
topology: v5e:2x2
jax: 0.10.0
libtpu: 0.0.40
codegen_flags: <defaults>
</compile_context>

<pallas_src>
import math

import jax
import jax.numpy as jnp
from jax import lax
from jax.experimental import pallas as pl
from jax.experimental.pallas import tpu as pltpu

HIDDEN = 32          # hidden_size (small stand-in for 200)
NUM_HEADS = 4
SEQ = 8
BATCH = 2
EPS = 1e-5           # nn.LayerNorm default eps


def _make_kernel(S, H, NH):
    HD = H // NH

    def kernel(x_ref, wqkv_ref, wo_ref, w1_ref, w2_ref, bqkv_ref, vec_ref, o_ref):
        # x_ref   : (1, S, H)  f32   one batch element per grid step
        # wqkv_ref: (H, 3H)    bf16  pre-transposed in-proj (Q cols pre-scaled)
        # wo_ref  : (H, H)     bf16  pre-transposed out-proj
        # w1_ref  : (H, H)     bf16  pre-transposed FFN weights
        # w2_ref  : (H, H)     bf16
        # bqkv_ref: (1, 3H)    f32   in-proj bias (Q part pre-scaled)
        # vec_ref : (8, H)     f32   rows = [bo, b1, b2, g1, beta1, g2, beta2, 0]
        x = x_ref[0]                                  # (S, H) f32
        bqkv = bqkv_ref[...]                          # (1, 3H)
        vec = vec_ref[...]                            # (8, H); row-indexed (free)
        bo, b1, b2 = vec[0:1], vec[1:2], vec[2:3]
        g1, be1 = vec[3:4], vec[4:5]
        g2, be2 = vec[5:6], vec[6:7]

        bf16 = jnp.bfloat16

        # --- QKV projection: one matmul, bf16 inputs, f32 accumulation --------
        qkv = jnp.dot(x.astype(bf16), wqkv_ref[...],
                      preferred_element_type=jnp.float32) + bqkv     # (S, 3H)

        def heads(off):
            # single fused reshape + transpose -> (NH, S, HD), head-major
            z = qkv[:, off:off + H].reshape(S, NH, HD)
            return jnp.transpose(z, (1, 0, 2))

        q = heads(0)          # 1/sqrt(HD) already folded into Wq / bq
        k = heads(H)
        v = heads(2 * H)

        # --- attention: head-batched matmuls for scores and P@V ---------------
        s = jnp.einsum("nqd,nkd->nqk", q.astype(bf16), k.astype(bf16),
                       preferred_element_type=jnp.float32)           # (NH, S, S)
        s = s - jnp.max(s, axis=-1, keepdims=True)
        p = jnp.exp(s)
        p = p / jnp.sum(p, axis=-1, keepdims=True)    # exact normalization
        ctx = jnp.einsum("nqk,nkd->nqd", p.astype(bf16), v.astype(bf16),
                         preferred_element_type=jnp.float32)          # (NH, S, HD)

        # heads back onto lanes (PyTorch concat order), then ONE dense out-proj
        ctx = jnp.transpose(ctx, (1, 0, 2)).reshape(S, H)
        attn = jnp.dot(ctx.astype(bf16), wo_ref[...],
                       preferred_element_type=jnp.float32) + bo       # (S, H)

        def layer_norm(z, g, b):
            mu = jnp.mean(z, axis=-1, keepdims=True)
            c = z - mu
            var = jnp.mean(c * c, axis=-1, keepdims=True)
            return c * lax.rsqrt(var + EPS) * g + b

        # dropout = identity (eval) + residual + LayerNorm1
        y = layer_norm(attn + x, g1, be1)

        # feedforward: Linear -> ReLU -> (Dropout = id) -> Linear
        h1 = jnp.dot(y.astype(bf16), w1_ref[...],
                     preferred_element_type=jnp.float32) + b1
        h1 = jnp.maximum(h1, 0.0)
        h2 = jnp.dot(h1.astype(bf16), w2_ref[...],
                     preferred_element_type=jnp.float32) + b2

        # dropout = identity (eval) + residual + LayerNorm2
        out = layer_norm(h2 + y, g2, be2)
        o_ref[0] = out.astype(o_ref.dtype)

    return kernel


def prepare_operands(params, num_heads):
    """One-time host prep: transpose weights, cast them to bf16, fold the
    attention scale into Wq/bq, pack the (H,) vectors as rows of one (8,H)."""
    H = params["wo"].shape[0]
    HD = H // num_heads
    scale = 1.0 / math.sqrt(HD)

    wqkv = params["wqkv"]                         # (3H, H) PyTorch in_proj_weight
    bqkv = params["bqkv"]                         # (3H,)
    wqkv = jnp.concatenate([wqkv[:H] * scale, wqkv[H:]], axis=0)
    bqkv = jnp.concatenate([bqkv[:H] * scale, bqkv[H:]], axis=0)

    wqkv_t = wqkv.T.astype(jnp.bfloat16)          # (H, 3H)
    wo_t = params["wo"].T.astype(jnp.bfloat16)    # (H, H)
    w1_t = params["w1"].T.astype(jnp.bfloat16)
    w2_t = params["w2"].T.astype(jnp.bfloat16)

    bqkv_row = bqkv[None, :]                      # (1, 3H) f32
    vec = jnp.stack([params["bo"], params["b1"], params["b2"],
                     params["g1"], params["beta1"], params["g2"], params["beta2"],
                     jnp.zeros((H,), jnp.float32)], axis=0)          # (8, H) f32
    return wqkv_t, wo_t, w1_t, w2_t, bqkv_row, vec


def transformer_layer(x, operands, num_heads=NUM_HEADS):
    B, S, H = x.shape
    wqkv_t, wo_t, w1_t, w2_t, bqkv_row, vec = operands

    return pl.pallas_call(
        _make_kernel(S, H, num_heads),
        out_shape=jax.ShapeDtypeStruct((B, S, H), x.dtype),
        grid=(B,),
        in_specs=[
            pl.BlockSpec((1, S, H), lambda b: (b, 0, 0)),      # activations
            # weights / biases: constant block index -> DMA'd once, stay resident
            pl.BlockSpec((H, 3 * H), lambda b: (0, 0)),
            pl.BlockSpec((H, H), lambda b: (0, 0)),
            pl.BlockSpec((H, H), lambda b: (0, 0)),
            pl.BlockSpec((H, H), lambda b: (0, 0)),
            pl.BlockSpec((1, 3 * H), lambda b: (0, 0)),
            pl.BlockSpec((8, H), lambda b: (0, 0)),
        ],
        out_specs=pl.BlockSpec((1, S, H), lambda b: (b, 0, 0)),
        compiler_params=pltpu.CompilerParams(
            # batch axis is independent work -> shards across v7x's 2 TCs
            dimension_semantics=("parallel",),
            # explicit (v5e scoped default is only 16 MiB)
            vmem_limit_bytes=32 * 1024 * 1024),
    )(x, wqkv_t, wo_t, w1_t, w2_t, bqkv_row, vec)


def init_params(key, hidden):
    ks = jax.random.split(key, 8)
    s = 1.0 / math.sqrt(hidden)
    return {
        # nn.MultiheadAttention: in_proj (3H, H) + bias, out_proj (H, H) + bias
        "wqkv": jax.random.normal(ks[0], (3 * hidden, hidden), jnp.float32) * s,
        "bqkv": jax.random.normal(ks[1], (3 * hidden,), jnp.float32) * 0.01,
        "wo":   jax.random.normal(ks[2], (hidden, hidden), jnp.float32) * s,
        "bo":   jax.random.normal(ks[3], (hidden,), jnp.float32) * 0.01,
        # feedforward: Linear(H,H), Linear(H,H)
        "w1":   jax.random.normal(ks[4], (hidden, hidden), jnp.float32) * s,
        "b1":   jax.random.normal(ks[5], (hidden,), jnp.float32) * 0.01,
        "w2":   jax.random.normal(ks[6], (hidden, hidden), jnp.float32) * s,
        "b2":   jax.random.normal(ks[7], (hidden,), jnp.float32) * 0.01,
        # LayerNorms: default init gamma=1, beta=0
        "g1":    jnp.ones((hidden,), jnp.float32),
        "beta1": jnp.zeros((hidden,), jnp.float32),
        "g2":    jnp.ones((hidden,), jnp.float32),
        "beta2": jnp.zeros((hidden,), jnp.float32),
    }


def reference(x, p, num_heads=NUM_HEADS):
    """Pure-JAX f32 reference of the PyTorch forward (eval mode)."""
    B, S, H = x.shape
    HD = H // num_heads

    def layer_norm(z, g, b):
        mu = jnp.mean(z, axis=-1, keepdims=True)
        var = jnp.mean((z - mu) ** 2, axis=-1, keepdims=True)
        return (z - mu) / jnp.sqrt(var + EPS) * g + b

    qkv = x @ p["wqkv"].T + p["bqkv"]
    q, k, v = qkv[..., :H], qkv[..., H:2 * H], qkv[..., 2 * H:]
    q = q.reshape(B, S, num_heads, HD).transpose(0, 2, 1, 3)
    k = k.reshape(B, S, num_heads, HD).transpose(0, 2, 1, 3)
    v = v.reshape(B, S, num_heads, HD).transpose(0, 2, 1, 3)
    s = (q @ k.transpose(0, 1, 3, 2)) / math.sqrt(HD)
    a = jax.nn.softmax(s, axis=-1)
    o = (a @ v).transpose(0, 2, 1, 3).reshape(B, S, H)
    o = o @ p["wo"].T + p["bo"]
    y = layer_norm(o + x, p["g1"], p["beta1"])
    ff = jnp.maximum(y @ p["w1"].T + p["b1"], 0.0) @ p["w2"].T + p["b2"]
    return layer_norm(ff + y, p["g2"], p["beta2"])


if __name__ == "__main__":
    key = jax.random.PRNGKey(0)
    kx, kp = jax.random.split(key)
    x = jax.random.normal(kx, (BATCH, SEQ, HIDDEN), jnp.float32)
    params = init_params(kp, HIDDEN)

    operands = prepare_operands(params, NUM_HEADS)      # one-time host prep
    out = transformer_layer(x, operands, NUM_HEADS)
    out = jax.block_until_ready(out)

    ref = reference(x, params, NUM_HEADS)
    assert out.shape == (BATCH, SEQ, HIDDEN)
    # bf16 MXU inputs (f32 accumulation) trade ~1e-2-level abs error vs the
    # pure-f32 reference for native MXU throughput; softmax itself is exact.
    err = float(jnp.max(jnp.abs(out - ref)))
    assert jnp.allclose(out, ref, rtol=5e-2, atol=5e-2), (
        f"mismatch vs reference, max abs err {err}")
    print("KERNEL_OK")
</pallas_src>

<mosaic_0001>
module attributes {stable_mosaic.version = 11 : i64} {
  func.func @kernel(%arg0: i32, %arg1: memref<1x8x32xf32, #tpu.memory_space<vmem>>, %arg2: memref<32x96xbf16, #tpu.memory_space<vmem>>, %arg3: memref<32x32xbf16, #tpu.memory_space<vmem>>, %arg4: memref<32x32xbf16, #tpu.memory_space<vmem>>, %arg5: memref<32x32xbf16, #tpu.memory_space<vmem>>, %arg6: memref<1x96xf32, #tpu.memory_space<vmem>>, %arg7: memref<8x32xf32, #tpu.memory_space<vmem>>, %arg8: memref<1x8x32xf32, #tpu.memory_space<vmem>>) attributes {dimension_semantics = [#tpu.dimension_semantics<parallel>], iteration_bounds = array<i64: 2>, scalar_prefetch = 0 : i64, scratch_operands = 0 : i64, tpu.core_type = #tpu.core_type<tc>, window_params = [{transform_indices = @transform_0, window_bounds = array<i64: 1, 8, 32>}, {pipeline_mode = #tpu.pipeline_mode<synchronous>, transform_indices = @transform_1, window_bounds = array<i64: 32, 96>}, {pipeline_mode = #tpu.pipeline_mode<synchronous>, transform_indices = @transform_2, window_bounds = array<i64: 32, 32>}, {pipeline_mode = #tpu.pipeline_mode<synchronous>, transform_indices = @transform_3, window_bounds = array<i64: 32, 32>}, {pipeline_mode = #tpu.pipeline_mode<synchronous>, transform_indices = @transform_4, window_bounds = array<i64: 32, 32>}, {pipeline_mode = #tpu.pipeline_mode<synchronous>, transform_indices = @transform_5, window_bounds = array<i64: 1, 96>}, {pipeline_mode = #tpu.pipeline_mode<synchronous>, transform_indices = @transform_6, window_bounds = array<i64: 8, 32>}, {transform_indices = @transform_7, window_bounds = array<i64: 1, 8, 32>}]} {
    %c0 = arith.constant 0 : index
    %c0_0 = arith.constant 0 : index
    %c0_1 = arith.constant 0 : index
    %0 = vector.load %arg1[%c0, %c0_0, %c0_1] : memref<1x8x32xf32, #tpu.memory_space<vmem>>, vector<1x8x32xf32>
    %1 = vector.shape_cast %0 : vector<1x8x32xf32> to vector<8x32xf32>
    %c0_2 = arith.constant 0 : index
    %c0_3 = arith.constant 0 : index
    %2 = vector.load %arg6[%c0_2, %c0_3] : memref<1x96xf32, #tpu.memory_space<vmem>>, vector<1x96xf32>
    %c0_4 = arith.constant 0 : index
    %c0_5 = arith.constant 0 : index
    %3 = vector.load %arg7[%c0_4, %c0_5] : memref<8x32xf32, #tpu.memory_space<vmem>>, vector<8x32xf32>
    %4 = vector.extract_strided_slice %3 {offsets = [0, 0], sizes = [1, 32], strides = [1, 1]} : vector<8x32xf32> to vector<1x32xf32>
    %5 = vector.extract_strided_slice %3 {offsets = [1, 0], sizes = [1, 32], strides = [1, 1]} : vector<8x32xf32> to vector<1x32xf32>
    %6 = vector.extract_strided_slice %3 {offsets = [2, 0], sizes = [1, 32], strides = [1, 1]} : vector<8x32xf32> to vector<1x32xf32>
    %7 = vector.extract_strided_slice %3 {offsets = [3, 0], sizes = [1, 32], strides = [1, 1]} : vector<8x32xf32> to vector<1x32xf32>
    %8 = vector.extract_strided_slice %3 {offsets = [4, 0], sizes = [1, 32], strides = [1, 1]} : vector<8x32xf32> to vector<1x32xf32>
    %9 = vector.extract_strided_slice %3 {offsets = [5, 0], sizes = [1, 32], strides = [1, 1]} : vector<8x32xf32> to vector<1x32xf32>
    %10 = vector.extract_strided_slice %3 {offsets = [6, 0], sizes = [1, 32], strides = [1, 1]} : vector<8x32xf32> to vector<1x32xf32>
    %11 = arith.truncf %1 : vector<8x32xf32> to vector<8x32xbf16>
    %c0_6 = arith.constant 0 : index
    %c0_7 = arith.constant 0 : index
    %12 = vector.load %arg2[%c0_6, %c0_7] : memref<32x96xbf16, #tpu.memory_space<vmem>>, vector<32x96xbf16>
    %cst = arith.constant dense<0.000000e+00> : vector<8x96xf32>
    %13 = tpu.matmul %11, %12, %cst {dimension_numbers = #tpu.dot_dimension_numbers<[1], [0], [0], [1], [0, 0, 1, 1], [], []>} : vector<8x32xbf16>, vector<32x96xbf16>, vector<8x96xf32> -> vector<8x96xf32>
    %14 = vector.broadcast %2 : vector<1x96xf32> to vector<8x96xf32>
    %15 = arith.addf %13, %14 : vector<8x96xf32>
    %16 = vector.extract_strided_slice %15 {offsets = [0, 0], sizes = [8, 32], strides = [1, 1]} : vector<8x96xf32> to vector<8x32xf32>
    %17 = vector.shape_cast %16 : vector<8x32xf32> to vector<8x4x8xf32>
    %18 = tpu.transpose %17, [1, 0, 2] : vector<8x4x8xf32> -> vector<4x8x8xf32>
    %19 = vector.extract_strided_slice %15 {offsets = [0, 32], sizes = [8, 32], strides = [1, 1]} : vector<8x96xf32> to vector<8x32xf32>
    %20 = vector.shape_cast %19 : vector<8x32xf32> to vector<8x4x8xf32>
    %21 = tpu.transpose %20, [1, 0, 2] : vector<8x4x8xf32> -> vector<4x8x8xf32>
    %22 = vector.extract_strided_slice %15 {offsets = [0, 64], sizes = [8, 32], strides = [1, 1]} : vector<8x96xf32> to vector<8x32xf32>
    %23 = vector.shape_cast %22 : vector<8x32xf32> to vector<8x4x8xf32>
    %24 = tpu.transpose %23, [1, 0, 2] : vector<8x4x8xf32> -> vector<4x8x8xf32>
    %25 = arith.truncf %18 : vector<4x8x8xf32> to vector<4x8x8xbf16>
    %26 = arith.truncf %21 : vector<4x8x8xf32> to vector<4x8x8xbf16>
    "tpu.trace_start"() <{level = 10 : i32, message = "nqd,nkd->nqk"}> : () -> ()
    %cst_8 = arith.constant dense<0.000000e+00> : vector<4x8x8xf32>
    %27 = tpu.matmul %25, %26, %cst_8 {dimension_numbers = #tpu.dot_dimension_numbers<[2], [2], [1], [1], [0, 0, 0, 1, 1, 1], [0], [0]>} : vector<4x8x8xbf16>, vector<4x8x8xbf16>, vector<4x8x8xf32> -> vector<4x8x8xf32>
    "tpu.trace_stop"() : () -> ()
    %cst_9 = arith.constant dense<0xFF800000> : vector<4x8xf32>
    %28 = vector.multi_reduction <maximumf>, %27, %cst_9 [2] : vector<4x8x8xf32> to vector<4x8xf32>
    %29 = vector.shape_cast %28 : vector<4x8xf32> to vector<4x8x1xf32>
    %30 = vector.broadcast %29 : vector<4x8x1xf32> to vector<4x8x8xf32>
    %31 = arith.subf %27, %30 : vector<4x8x8xf32>
    %32 = math.exp %31 : vector<4x8x8xf32>
    %cst_10 = arith.constant dense<0.000000e+00> : vector<4x8xf32>
    %33 = vector.multi_reduction <add>, %32, %cst_10 [2] : vector<4x8x8xf32> to vector<4x8xf32>
    %34 = vector.shape_cast %33 : vector<4x8xf32> to vector<4x8x1xf32>
    %35 = vector.broadcast %34 : vector<4x8x1xf32> to vector<4x8x8xf32>
    %36 = arith.divf %32, %35 : vector<4x8x8xf32>
    %37 = arith.truncf %36 : vector<4x8x8xf32> to vector<4x8x8xbf16>
    %38 = arith.truncf %24 : vector<4x8x8xf32> to vector<4x8x8xbf16>
    "tpu.trace_start"() <{level = 10 : i32, message = "nqk,nkd->nqd"}> : () -> ()
    %cst_11 = arith.constant dense<0.000000e+00> : vector<4x8x8xf32>
    %39 = tpu.matmul %37, %38, %cst_11 {dimension_numbers = #tpu.dot_dimension_numbers<[2], [1], [1], [2], [0, 0, 0, 1, 1, 2], [0], [0]>} : vector<4x8x8xbf16>, vector<4x8x8xbf16>, vector<4x8x8xf32> -> vector<4x8x8xf32>
    "tpu.trace_stop"() : () -> ()
    %40 = tpu.transpose %39, [1, 0, 2] : vector<4x8x8xf32> -> vector<8x4x8xf32>
    %41 = vector.shape_cast %40 : vector<8x4x8xf32> to vector<8x32xf32>
    %42 = arith.truncf %41 : vector<8x32xf32> to vector<8x32xbf16>
    %c0_12 = arith.constant 0 : index
    %c0_13 = arith.constant 0 : index
    %43 = vector.load %arg3[%c0_12, %c0_13] : memref<32x32xbf16, #tpu.memory_space<vmem>>, vector<32x32xbf16>
    %cst_14 = arith.constant dense<0.000000e+00> : vector<8x32xf32>
    %44 = tpu.matmul %42, %43, %cst_14 {dimension_numbers = #tpu.dot_dimension_numbers<[1], [0], [0], [1], [0, 0, 1, 1], [], []>} : vector<8x32xbf16>, vector<32x32xbf16>, vector<8x32xf32> -> vector<8x32xf32>
    %45 = vector.broadcast %4 : vector<1x32xf32> to vector<8x32xf32>
    %46 = arith.addf %44, %45 : vector<8x32xf32>
    %47 = arith.addf %46, %1 : vector<8x32xf32>
    %cst_15 = arith.constant dense<0.000000e+00> : vector<8xf32>
    %48 = vector.multi_reduction <add>, %47, %cst_15 [1] : vector<8x32xf32> to vector<8xf32>
    %49 = vector.shape_cast %48 : vector<8xf32> to vector<8x1xf32>
    %cst_16 = arith.constant 3.200000e+01 : f32
    %50 = vector.broadcast %cst_16 : f32 to vector<8x1xf32>
    %51 = arith.divf %49, %50 : vector<8x1xf32>
    %52 = vector.broadcast %51 : vector<8x1xf32> to vector<8x32xf32>
    %53 = arith.subf %47, %52 : vector<8x32xf32>
    %54 = arith.mulf %53, %53 : vector<8x32xf32>
    %cst_17 = arith.constant dense<0.000000e+00> : vector<8xf32>
    %55 = vector.multi_reduction <add>, %54, %cst_17 [1] : vector<8x32xf32> to vector<8xf32>
    %56 = vector.shape_cast %55 : vector<8xf32> to vector<8x1xf32>
    %cst_18 = arith.constant 3.200000e+01 : f32
    %57 = vector.broadcast %cst_18 : f32 to vector<8x1xf32>
    %58 = arith.divf %56, %57 : vector<8x1xf32>
    %cst_19 = arith.constant 9.99999974E-6 : f32
    %59 = vector.broadcast %cst_19 : f32 to vector<8x1xf32>
    %60 = arith.addf %58, %59 : vector<8x1xf32>
    %61 = math.rsqrt %60 : vector<8x1xf32>
    %62 = vector.broadcast %61 : vector<8x1xf32> to vector<8x32xf32>
    %63 = arith.mulf %53, %62 : vector<8x32xf32>
    %64 = vector.broadcast %7 : vector<1x32xf32> to vector<8x32xf32>
    %65 = arith.mulf %63, %64 : vector<8x32xf32>
    %66 = vector.broadcast %8 : vector<1x32xf32> to vector<8x32xf32>
    %67 = arith.addf %65, %66 : vector<8x32xf32>
    %68 = arith.truncf %67 : vector<8x32xf32> to vector<8x32xbf16>
    %c0_20 = arith.constant 0 : index
    %c0_21 = arith.constant 0 : index
    %69 = vector.load %arg4[%c0_20, %c0_21] : memref<32x32xbf16, #tpu.memory_space<vmem>>, vector<32x32xbf16>
    %cst_22 = arith.constant dense<0.000000e+00> : vector<8x32xf32>
    %70 = tpu.matmul %68, %69, %cst_22 {dimension_numbers = #tpu.dot_dimension_numbers<[1], [0], [0], [1], [0, 0, 1, 1], [], []>} : vector<8x32xbf16>, vector<32x32xbf16>, vector<8x32xf32> -> vector<8x32xf32>
    %71 = vector.broadcast %5 : vector<1x32xf32> to vector<8x32xf32>
    %72 = arith.addf %70, %71 : vector<8x32xf32>
    %cst_23 = arith.constant 0.000000e+00 : f32
    %73 = vector.broadcast %cst_23 : f32 to vector<8x32xf32>
    %74 = arith.maximumf %72, %73 : vector<8x32xf32>
    %75 = arith.truncf %74 : vector<8x32xf32> to vector<8x32xbf16>
    %c0_24 = arith.constant 0 : index
    %c0_25 = arith.constant 0 : index
    %76 = vector.load %arg5[%c0_24, %c0_25] : memref<32x32xbf16, #tpu.memory_space<vmem>>, vector<32x32xbf16>
    %cst_26 = arith.constant dense<0.000000e+00> : vector<8x32xf32>
    %77 = tpu.matmul %75, %76, %cst_26 {dimension_numbers = #tpu.dot_dimension_numbers<[1], [0], [0], [1], [0, 0, 1, 1], [], []>} : vector<8x32xbf16>, vector<32x32xbf16>, vector<8x32xf32> -> vector<8x32xf32>
    %78 = vector.broadcast %6 : vector<1x32xf32> to vector<8x32xf32>
    %79 = arith.addf %77, %78 : vector<8x32xf32>
    %80 = arith.addf %79, %67 : vector<8x32xf32>
    %cst_27 = arith.constant dense<0.000000e+00> : vector<8xf32>
    %81 = vector.multi_reduction <add>, %80, %cst_27 [1] : vector<8x32xf32> to vector<8xf32>
    %82 = vector.shape_cast %81 : vector<8xf32> to vector<8x1xf32>
    %cst_28 = arith.constant 3.200000e+01 : f32
    %83 = vector.broadcast %cst_28 : f32 to vector<8x1xf32>
    %84 = arith.divf %82, %83 : vector<8x1xf32>
    %85 = vector.broadcast %84 : vector<8x1xf32> to vector<8x32xf32>
    %86 = arith.subf %80, %85 : vector<8x32xf32>
    %87 = arith.mulf %86, %86 : vector<8x32xf32>
    %cst_29 = arith.constant dense<0.000000e+00> : vector<8xf32>
    %88 = vector.multi_reduction <add>, %87, %cst_29 [1] : vector<8x32xf32> to vector<8xf32>
    %89 = vector.shape_cast %88 : vector<8xf32> to vector<8x1xf32>
    %cst_30 = arith.constant 3.200000e+01 : f32
    %90 = vector.broadcast %cst_30 : f32 to vector<8x1xf32>
    %91 = arith.divf %89, %90 : vector<8x1xf32>
    %cst_31 = arith.constant 9.99999974E-6 : f32
    %92 = vector.broadcast %cst_31 : f32 to vector<8x1xf32>
    %93 = arith.addf %91, %92 : vector<8x1xf32>
    %94 = math.rsqrt %93 : vector<8x1xf32>
    %95 = vector.broadcast %94 : vector<8x1xf32> to vector<8x32xf32>
    %96 = arith.mulf %86, %95 : vector<8x32xf32>
    %97 = vector.broadcast %9 : vector<1x32xf32> to vector<8x32xf32>
    %98 = arith.mulf %96, %97 : vector<8x32xf32>
    %99 = vector.broadcast %10 : vector<1x32xf32> to vector<8x32xf32>
    %100 = arith.addf %98, %99 : vector<8x32xf32>
    %c0_32 = arith.constant 0 : index
    %c0_33 = arith.constant 0 : index
    %c0_34 = arith.constant 0 : index
    %101 = vector.load %arg8[%c0_32, %c0_33, %c0_34] : memref<1x8x32xf32, #tpu.memory_space<vmem>>, vector<1x8x32xf32>
    %102 = vector.shape_cast %101 : vector<1x8x32xf32> to vector<8x32xf32>
    %103 = vector.shape_cast %100 : vector<8x32xf32> to vector<1x8x32xf32>
    tpu.vector_store %arg8[%c0_32, %c0_33, %c0_34], %103 {strides = array<i32>} : memref<1x8x32xf32, #tpu.memory_space<vmem>>, vector<1x8x32xf32>,
    return
  }
  func.func @transform_0(%arg0: i32) -> (i32, i32, i32) {
    %c0_i32 = arith.constant 0 : i32
    %c0_i32_0 = arith.constant 0 : i32
    %c0_i32_1 = arith.constant 0 : i32
    return %arg0, %c0_i32, %c0_i32_0 : i32, i32, i32
  }
  func.func @transform_1(%arg0: i32) -> (i32, i32) {
    %c0_i32 = arith.constant 0 : i32
    %c0_i32_0 = arith.constant 0 : i32
    %c0_i32_1 = arith.constant 0 : i32
    return %c0_i32, %c0_i32_0 : i32, i32
  }
  func.func @transform_2(%arg0: i32) -> (i32, i32) {
    %c0_i32 = arith.constant 0 : i32
    %c0_i32_0 = arith.constant 0 : i32
    %c0_i32_1 = arith.constant 0 : i32
    return %c0_i32, %c0_i32_0 : i32, i32
  }
  func.func @transform_3(%arg0: i32) -> (i32, i32) {
    %c0_i32 = arith.constant 0 : i32
    %c0_i32_0 = arith.constant 0 : i32
    %c0_i32_1 = arith.constant 0 : i32
    return %c0_i32, %c0_i32_0 : i32, i32
  }
  func.func @transform_4(%arg0: i32) -> (i32, i32) {
    %c0_i32 = arith.constant 0 : i32
    %c0_i32_0 = arith.constant 0 : i32
    %c0_i32_1 = arith.constant 0 : i32
    return %c0_i32, %c0_i32_0 : i32, i32
  }
  func.func @transform_5(%arg0: i32) -> (i32, i32) {
    %c0_i32 = arith.constant 0 : i32
    %c0_i32_0 = arith.constant 0 : i32
    %c0_i32_1 = arith.constant 0 : i32
    return %c0_i32, %c0_i32_0 : i32, i32
  }
  func.func @transform_6(%arg0: i32) -> (i32, i32) {
    %c0_i32 = arith.constant 0 : i32
    %c0_i32_0 = arith.constant 0 : i32
    %c0_i32_1 = arith.constant 0 : i32
    return %c0_i32, %c0_i32_0 : i32, i32
  }
  func.func @transform_7(%arg0: i32) -> (i32, i32, i32) {
    %c0_i32 = arith.constant 0 : i32
    %c0_i32_0 = arith.constant 0 : i32
    %c0_i32_1 = arith.constant 0 : i32
    return %arg0, %c0_i32, %c0_i32_0 : i32, i32, i32
  }
}

</mosaic_0001>

<bundles_post_ra>
// kernel: tpu_custom_call.1
= control target key start
LH: loop header
LB: loop body
LE: loop exit
PB: predicated region body
PF: predicated region fallthrough
CT: control target
= control target key end

     0   :  { %s2433_s0 = inlined_call_operand.hbm [shape: f32[2,8,32], index: 0, kind: input, shape index: {}]   ;;  %s2434_s1 = inlined_call_operand.hbm [shape: bf16[32,96], index: 1, kind: input, shape index: {}]   ;;  %s2435_s2 = inlined_call_operand.hbm [shape: bf16[32,32], index: 2, kind: input, shape index: {}]   ;;  %s2436_s3 = inlined_call_operand.hbm [shape: bf16[32,32], index: 3, kind: input, shape index: {}]   ;;  %s2437_s4 = inlined_call_operand.hbm [shape: bf16[32,32], index: 4, kind: input, shape index: {}]   ;;  %s2438_s5 = inlined_call_operand.vmem [shape: f32[1,96], index: 5, kind: input, shape index: {}]   ;;  %s2439_s6 = inlined_call_operand.hbm [shape: f32[8,32], index: 6, kind: input, shape index: {}]   ;;  %s2440_s7 = inlined_call_operand.hbm [shape: f32[2,8,32], index: 7, kind: output, shape index: {}]  }
   0x1   :  { %2441 = sst [smem:[#allocation19_spill]] %s2434_s1 }
   0x2   :  { %12 = vsyncpa [#allocation3], 0 }
   0x3   :  { %14 = vsyncpa [#allocation3 + $0x1], 0 }
   0x4   :  { %15 = vsyncpa [#allocation6], 0 }
   0x5   :  { %16 = vsyncpa [#allocation9], 0 }
   0x6   :  { %17 = vsyncpa [#allocation12], 0 }
   0x7   :  { %18 = vsyncpa [#allocation4], 0 }
   0x8   :  { %20 = vsyncpa [#allocation4 + $0x1], 0  ;;  %s2020_s24 = smov 0   ;;  %s2022_s25 = smov 0  }
   0x9   :  { %s2024_s26 = smov 0   ;;  %s2026_s27 = smov 0  }
   0xa LB: > { %s2442_s1 = sld [smem:[#allocation19_spill]]  ;;  %s2044_s8 = sadd.s32 4294967295, %s1960_s27   ;;  %s1960_s27 = sphi %s2026_s27, %s2453_s27   ;;  %s1956_s26 = sphi %s2024_s26, %s2452_s26   ;;  %s1952_s25 = sphi %s2022_s25, %s2451_s25   ;;  %s1948_s24 = sphi %s2020_s24, %s2450_s24  }
   0xb   : > { %p1476_p0 = scmp.ge.s32.totalorder %s1960_s27, 1  ;;  %p47_p1 = scmp.eq.s32.totalorder %s2044_s8, 0 }
   0xc   : > { %p209_p2 = scmp.lt.s32.totalorder %s1960_s27, 3  ;;  %s1962_s10 = smov [#allocation5]  }
   0xd   : > { %s222_s11 = sshll.u32 %s1962_s10, 4  ;;  %s248_s14 = sshll.u32 %s2436_s3, 4  ;;  %s223_s11 = int_to_ptr.vmem [resolvable:$true] %s222_s11  ;;  %s249_s14 = int_to_ptr.hbm [resolvable:$true] %s248_s14 }
   0xe   : > { %p2049_p3 = pnand %p1476_p0, %p209_p2  ;;  %s234_s18 = sshll.u32 %s2435_s2, 4  ;;  %s235_s18 = int_to_ptr.hbm [resolvable:$true] %s234_s18 }
   0xf   : > { %s1963_s19 = smov [#allocation8]   ;;  %s1964_s21 = smov 64  }
  0x10   : > { %s220_s30 = sshll.u32 %s2442_s1, 4  ;;  %p1573_p4 = pneg %p2049_p3  ;;  %s221_s30 = int_to_ptr.hbm [resolvable:$true] %s220_s30 }
  0x11   : > { %s250_s20 = sshll.u32 %s1963_s19, 4  ;;  %s1965_s22 = smov 4   ;;  %s251_s20 = int_to_ptr.vmem [resolvable:$true] %s250_s20 }
  0x12   : > { %p2061_p6 = pnand %p1573_p4, %p47_p1  ;;  %s262_s29 = sshll.u32 %s2437_s4, 4  ;;  %s263_s29 = int_to_ptr.hbm [resolvable:$true] %s262_s29 }
  0x13   : > { %s1966_s10 = smov [#allocation7]   ;;  %s280_s16 = sshll.u32 %s2439_s6, 4  ;;  %s281_s16 = int_to_ptr.hbm [resolvable:$true] %s280_s16 }
  0x14   : > { %1576 = dma.hbm_to_vmem [thread:$0]  (!%p2061_p6), %s221_s30, 256, %s223_s11, [#allocation6], %s1964_s21, %s1964_s21, %s1965_s22  }
  0x15   : > { %1582 = dma.hbm_to_vmem [thread:$0]  (!%p2061_p6), %s249_s14, 256, %s251_s20, [#allocation9], %s1964_s21, %s1964_s21, %s1965_s22  }
  0x16   : > { %s236_s12 = sshll.u32 %s1966_s10, 4  ;;  %s1967_s30 = smov [#allocation10]   ;;  %s237_s12 = int_to_ptr.vmem [resolvable:$true] %s236_s12 }
  0x17   : > { %1579 = dma.hbm_to_vmem [thread:$0]  (!%p2061_p6), %s235_s18, 256, %s237_s12, [#allocation6], %s1964_s21, %s1964_s21, %s1965_s22  }
  0x18   : > { %s264_s11 = sshll.u32 %s1967_s30, 4  ;;  %s1968_s17 = smov [#allocation11]   ;;  %s265_s11 = int_to_ptr.vmem [resolvable:$true] %s264_s11 }
  0x19   : > { %1585 = dma.hbm_to_vmem [thread:$0]  (!%p2061_p6), %s263_s29, 256, %s265_s11, [#allocation9], %s1964_s21, %s1964_s21, %s1965_s22  }
  0x1a   : > { %s282_s19 = sshll.u32 %s1968_s17, 4  ;;  %s1475_s18 = sadd.s32 4294967294, %s1960_s27   ;;  %s283_s19 = int_to_ptr.vmem [resolvable:$true] %s282_s19 }
  0x1b   : > { %1588 = dma.hbm_to_vmem [thread:$0]  (!%p2061_p6), %s281_s16, 128, %s283_s19, [#allocation12]  }
  0x1c   : > { %s2086_s20 = sadd.s32 1, %s1960_s27   ;;  %s33_s23 = sadd.s32 1, %s1956_s26 }
  0x1d   : > { %s30_s28 = ssub.s32 %s1960_s27, %s2086_s20  ;;  %p40_p7 = scmp.ne.s32.totalorder %s1956_s26, %s1952_s25 }
  0x1e   : > { %p31_p8 = scmp.eq.s32.totalorder %s30_s28, 0  ;;  %p41_p9 = scmp.eq.s32.totalorder %s1960_s27, 0 }
  0x1f   : > { %p46_p10 = scmp.ne.s32.totalorder %s1952_s25, %s1948_s24  ;;  %p196_p11 = scmp.eq.s32.totalorder %s2044_s8, 1 }
  0x20   : > { %s2098_s21 = scalar_select %p31_p8, %s1956_s26, %s33_s23  }
  0x21   : > { %p2102_p12 = por %p47_p1, %p46_p10  ;;  %p2106_p13 = por %p196_p11, %p40_p7 }
  0x22   : > { %p202_p0 = scmp.eq.s32.totalorder %s1475_s18, 1  ;;  %p42_p2 = por %p41_p9, %p40_p7 }
  0x23   : > { %s293_s29 = sand.u32 1, %s1956_s26   ;;  %p1602_p6 = scmp.lt.s32.totalorder %s1960_s27, 2 }
  0x24   : > { %p2111_p4 = por %p202_p0, %p46_p10  ;;  %s1483_s12 = sshll.u32 %s293_s29, 3 }
  0x25   : > { %s1484_s30 = sshll.u32 %s1960_s27, 3  ;;  %s297_s17 = scalar_lea.vmem [#allocation2], %s1483_s12 }
  0x26   : > { %s301_s14 = scalar_lea.hbm %s2433_s0, %s1484_s30  ;;  %s305_s19 = sshll.u32 %s297_s17, 4  ;;  %s306_s19 = int_to_ptr.vmem [resolvable:$true] %s305_s19 }
  0x27   : > { %s303_s16 = sshll.u32 %s301_s14, 4  ;;  %p2120_p8 = pnand %p1602_p6, %p42_p2  ;;  %s304_s16 = int_to_ptr.hbm [resolvable:$true] %s303_s16 }
  0x28   : > { %s294_s23 = scalar_lea.sflag [#allocation3], %s293_s29  ;;  %s1852_s28 = sshra.s32 %s304_s16, 4  ;;  %s1853_s28 = int_to_ptr.hbm [resolvable:$true] %s1852_s28 }
  0x29   : > { %s1854_s1 = scalar_lea.hbm %s1853_s28, 8  ;;  %p1856_p9 = pneg %p2120_p8 }
  0x2a   : > { %p1855_p7 = scmp.ne.s32.totalorder %s1853_s28, %s1854_s1  ;;  %s1859_s12 = scalar_lea.hbm %s2433_s0, 16 }
  0x2b   : > { %p1860_p0 = scmp.lt.s32.totalorder %s1853_s28, %s2433_s0  ;;  %p1861_p2 = scmp.lt.s32.totalorder %s1859_s12, %s1854_s1 }
  0x2c   : > { %p1857_p10 = pnand %p1856_p9, %p1855_p7 }
  0x2d   : > { %p1862_p6 = por %p1861_p2, %p1860_p0 }
  0x2e   : > { %p1858_p11 = pneg %p1857_p10 }
  0x30   : > { %p1863_p5 = pnand %p1862_p6, %p1858_p11 }
  0x32   : > { %1866 = shalt.err (!%p1863_p5)
}
  0x33   : > { %1592 = dma.hbm_to_vmem [thread:$0]  (!%p2120_p8), %s304_s16, 128, %s306_s19, %s294_s23  }
  0x34   : > { %314 = sbr.rel (%p2049_p3) target bundleno = 2096 (0x830), region = 48  ;;  %s2137_s29 = sand.u32 (!%p2049_p3), 1, %s1952_s25  }
  0x35   : > { %s1486_s17 = sshll.u32 (!%p2049_p3), %s2137_s29, 3  ;;  %s317_s30 = scalar_lea.sflag (!%p2049_p3), [#allocation3], %s2137_s29 }
  0x36   : > { %s320_s1 = scalar_lea.vmem (!%p2049_p3), [#allocation2], %s1486_s17 }
  0x39   : > { %1927 = dma.done.wait (%p2102_p12), %s317_s30, 128  }
  0x3a   : > { %1929 = vsyncadd (%p2102_p12), %s317_s30, 4294967168 }
  0x3b   : > { %1931 = dma.done.wait (%p47_p1), [#allocation6], 512  }
  0x3c   : > { %1933 = vsyncadd (%p47_p1), [#allocation6], 4294966784 }
  0x3d   : > { %1935 = dma.done.wait (%p47_p1), [#allocation9], 512  }
  0x3e   : > { %1937 = vsyncadd (%p47_p1), [#allocation9], 4294966784 }
  0x3f   : > { %1939 = dma.done.wait (%p47_p1), [#allocation12], 128  }
  0x40   : > { %1941 = vsyncadd (%p47_p1), [#allocation12], 4294967168  ;;  %v1542_v0 = vld [vmem:[#allocation5 + $0x8] sm:$0xff]  ;;  %v1541_v1 = vld [vmem:[#allocation5] sm:$0xff]  ;;  %vm401_vm0 = vcmask 261120   ;;  %s1969_s16 = smov 104  }
  0x41   : > { %411 = vmatpush.bf16.msra.mxu0 %v1542_v0  ;;  %v2159_v2 = vld [vmem:[%s320_s1] sm:$0xff]  ;;  %s1970_s19 = smov 120   ;;  %s1971_s18 = smov 112   ;;  %v1973_v14 = vmov 1983009808   ;;  %vm429_vm1 = vcmask 1047556  }
  0x42   : > { %v381_v3 = vpack.c.bf16 %v2159_v2, %v2159_v2  ;;  %v1679_v4 = vld [vmem:[%s2438_s5] ss:$0 sm:$0xff]  ;;  %s1972_s23 = smov 96   ;;  %v434_v15 = vunpack.c.l.s4 %v1973_v14  ;;  %v1974_v28 = vmov 1934713408   ;;  %vm791_vm2 = vcmask 64512  }
  0x43   : > { %v458_v29 = vunpack.c.l.s4 %v1974_v28  ;;  %s1975_s28 = smov 64   ;;  %vm975_vm3 = vcmask 1043456   ;;  %s1976_s11 = smov 16  }
  0x44   : > { %v2175_v19 = vunpack.c.0.s8 %v434_v15  ;;  %s1977_s12 = smov 8   ;;  %s1978_s13 = smov 24  }
  0x45   : > { %412 = vmatpush.bf16.msra.mxu0 %v1541_v1  ;;  %v2185_v34 = vunpack.c.0.s8 %v458_v29  ;;  %s1538_s14 = sshll.u32 %s2044_s8, 3  ;;  %s376_s15 = scalar_lea.vmem [#allocation13], %s1486_s17 }
  0x46   : > { %s1352_s9 = scalar_lea.hbm %s2440_s7, %s1538_s14  ;;  %s1342_s8 = scalar_lea.sflag [#allocation4], %s2137_s29 }
  0x47   : > { %s1902_s17 = scalar_lea.hbm %s2440_s7, 16 }
  0x48   : > { %1501 = vmatmul.msk.bf16.vlgmr.msra.gmra.mxu0 %vm401_vm0, %v381_v3 }
  0xc5   : > { %v414_v5 = vpop.f32.mrf.mxu0 }
  0xc6   : > { %v415_v6 = vadd.f32 %v1679_v4, %v414_v5 }
  0xc8   : > { %425 = vrot.lane.b32.xlu1 %v415_v6, %s1969_s16  ;;  %419 = vrot.lane.b32.xlu0 %v415_v6, %s1970_s19  ;;  %v431_v16 = vrot.slane %v415_v6, 4  ;;  %s1354_s16 = sshll.u32 %s376_s15, 4  ;;  %s1356_s19 = sshll.u32 %s1352_s9, 4  ;;  %s1355_s16 = int_to_ptr.vmem [resolvable:$true] %s1354_s16  ;;  %s1357_s19 = int_to_ptr.hbm [resolvable:$true] %s1356_s19 }
  0xcd   : > { %v416_v7 = vpop.f32.mrf.mxu0 }
  0xd0   : > { %422 = vrot.lane.b32.xlu0 %v415_v6, %s1971_s18  ;;  %s1896_s18 = sshra.s32 %s1357_s19, 4  ;;  %s1897_s18 = int_to_ptr.hbm [resolvable:$true] %s1896_s18 }
  0xd1   : > { %p1903_p12 = scmp.lt.s32.totalorder %s1897_s18, %s2440_s7 }
 0x13a   : > { %v420_v8 = vpop.permute.xlu0 %419  ;;  %v426_v10 = vpop.permute.xlu1 %425 }
 0x13b   : > { %v2167_v9 = vpack.i.bf16 %v420_v8, %v415_v6  ;;  %v441_v20 = vrot.slane %v426_v10, 4  ;;  %v443_v21 = vrot.slane %v420_v8, 4 }
 0x13d   : > { %1660 = vrot.lane.b32.xlu1 %v2167_v9, %s1972_s23  ;;  %v442_v24 = vsel %vm429_vm1, %v441_v20, %v420_v8  ;;  %v444_v25 = vsel %vm429_vm1, %v426_v10, %v443_v21 }
 0x13e   : > { %v448_v30 = vperm.slane %v442_v24, %v2175_v19  ;;  %v452_v31 = vperm.slane %v444_v25, %v2175_v19 }
 0x140   : > { %v453_v35 = vrot.slane %v448_v30, 4  ;;  %v465_v36 = vrot.slane %v452_v31, 4 }
 0x142   : > { %v423_v11 = vpop.permute.xlu0 %422 }
 0x143   : > { %v2170_v12 = vpack.i.bf16 %v426_v10, %v423_v11  ;;  %v428_v13 = vrot.slane %v423_v11, 4  ;;  %v432_v18 = vsel %vm429_vm1, %v423_v11, %v431_v16 }
 0x144   : > { %v440_v23 = vperm.slane %v432_v18, %v2175_v19 }
 0x145   : > { %1665 = vrot.lane.b32.xlu2 %v2170_v12, %s1972_s23  ;;  %v430_v17 = vsel %vm429_vm1, %v428_v13, %v415_v6  ;;  %s1898_s23 = scalar_lea.hbm %s1897_s18, 8 }
 0x146   : > { %v436_v22 = vperm.slane %v430_v17, %v2175_v19  ;;  %v467_v27 = vrot.slane %v440_v23, 4  ;;  %v466_v41 = vsel %vm429_vm1, %v465_v36, %v440_v23  ;;  %p1899_p1 = scmp.ne.s32.totalorder %s1897_s18, %s1898_s23  ;;  %p1904_p8 = scmp.lt.s32.totalorder %s1902_s17, %s1898_s23 }
 0x147   : > { %v472_v45 = vperm.slane %v466_v41, %v2185_v34 }
 0x148   : > { %v455_v26 = vrot.slane %v436_v22, 4  ;;  %v468_v33 = vsel %vm429_vm1, %v452_v31, %v467_v27  ;;  %v454_v40 = vsel %vm429_vm1, %v453_v35, %v436_v22  ;;  %p1900_p3 = pnand %p1899_p1, %p2106_p13  ;;  %p1905_p7 = por %p1904_p8, %p1903_p12 }
 0x149   : > { %v476_v38 = vperm.slane %v468_v33, %v2185_v34  ;;  %v460_v44 = vperm.slane %v454_v40, %v2185_v34  ;;  %v481_v55 = vrot.slane %v472_v45, 4 }
 0x14a   : > { %v456_v32 = vsel %vm429_vm1, %v448_v30, %v455_v26  ;;  %p1901_p5 = pneg %p1900_p3 }
 0x14b   : > { %v464_v37 = vperm.slane %v456_v32, %v2185_v34  ;;  %v483_v47 = vrot.slane %v476_v38, 4  ;;  %v477_v53 = vrot.slane %v460_v44, 4  ;;  %v482_v11 = vsel %vm429_vm1, 0.0, %v481_v55 }
 0x14c   : > { %p1906_p9 = pnand %p1905_p7, %p1901_p5 }
 0x14d   : > { %v479_v46 = vrot.slane %v464_v37, 4  ;;  %v484_v56 = vsel %vm429_vm1, 0.0, %v483_v47  ;;  %v496_v61 = vsel %vm429_vm1, %v483_v47, %v472_v45  ;;  %v478_v10 = vsel %vm429_vm1, 0.0, %v477_v53 }
 0x14e   : > { %v501_v1 = vrot.slane %v484_v56, 4  ;;  %v500_v18 = vperm.slane %v496_v61, %v2175_v19 }
 0x14f   : > { %v480_v54 = vsel %vm429_vm1, 0.0, %v479_v46  ;;  %v485_v13 = vsel %vm429_vm1, %v479_v46, %v460_v44 }
 0x150   : > { %v490_v0 = vrot.slane %v480_v54, 4  ;;  %v502_v23 = vsel %vm429_vm1, %v501_v1, %v482_v11  ;;  %v489_v26 = vperm.slane %v485_v13, %v2175_v19  ;;  %v521_v40 = vrot.slane %v500_v18, 4 }
 0x151   : > { %v506_v36 = vperm.slane %v502_v23, %v2175_v19 }
 0x152   : > { %v491_v22 = vsel %vm429_vm1, %v490_v0, %v478_v10 }
 0x153   : > { %v495_v31 = vperm.slane %v491_v22, %v2175_v19 }
 0x19f   : > { %v1666_v39 = vpop.permute.xlu2 %1665 }
 0x1a0   : > { %v1668_v42 = vunpack.i.h.bf16 %v1666_v39  ;;  %v1667_v43 = vunpack.i.l.bf16 %v1666_v39  ;;  %v509_v39 = vrot.slane %v489_v26, 4 }
 0x1a2   : > { %v563_v49 = vrot.slane %v1668_v42, 4  ;;  %v551_v50 = vrot.slane %v1667_v43, 4 }
 0x1af   : > { %v1661_v48 = vpop.permute.xlu1 %1660 }
 0x1b0   : > { %v1663_v51 = vunpack.i.h.bf16 %v1661_v48  ;;  %v1662_v52 = vunpack.i.l.bf16 %v1661_v48  ;;  %v507_v48 = vrot.slane %v495_v31, 4 }
 0x1b2   : > { %v565_v57 = vrot.slane %v1663_v51, 4  ;;  %v552_v58 = vsel %vm429_vm1, %v551_v50, %v1662_v52  ;;  %v553_v59 = vrot.slane %v1662_v52, 4  ;;  %v564_v60 = vsel %vm429_vm1, %v563_v49, %v1663_v51 }
 0x1b3   : > { %v558_v62 = vperm.slane %v552_v58, %v2175_v19  ;;  %v570_v63 = vperm.slane %v564_v60, %v2175_v19  ;;  %v519_v52 = vrot.slane %v506_v36, 4  ;;  %v510_v58 = vsel %vm429_vm1, %v495_v31, %v509_v39 }
 0x1b4   : > { %v554_v3 = vsel %vm429_vm1, %v1667_v43, %v553_v59  ;;  %v566_v4 = vsel %vm429_vm1, %v1668_v42, %v565_v57  ;;  %v522_v60 = vsel %vm429_vm1, %v506_v36, %v521_v40  ;;  %v508_v61 = vsel %vm429_vm1, %v507_v48, %v489_v26 }
 0x1b5   : > { %v562_v5 = vperm.slane %v554_v3, %v2175_v19  ;;  %v574_v6 = vperm.slane %v566_v4, %v2175_v19  ;;  %v575_v7 = vrot.slane %v570_v63, 4  ;;  %v577_v8 = vrot.slane %v558_v62, 4 }
 0x1b6   : > { %v520_v1 = vsel %vm429_vm1, %v519_v52, %v500_v18  ;;  %v514_v10 = vperm.slane %v508_v61, %v2185_v34 }
 0x1b7   : > { %v576_v14 = vsel %vm429_vm1, %v575_v7, %v558_v62  ;;  %v578_v15 = vsel %vm429_vm1, %v570_v63, %v577_v8  ;;  %v587_v16 = vrot.slane %v574_v6, 4  ;;  %v589_v17 = vrot.slane %v562_v5, 4 }
 0x1b8   : > { %v582_v20 = vperm.slane %v576_v14, %v2185_v34  ;;  %v586_v21 = vperm.slane %v578_v15, %v2185_v34  ;;  %v530_v8 = vperm.slane %v522_v60, %v2185_v34 }
 0x1b9   : > { %v588_v24 = vsel %vm429_vm1, %v587_v16, %v562_v5  ;;  %v590_v25 = vsel %vm429_vm1, %v574_v6, %v589_v17  ;;  %v518_v6 = vperm.slane %v510_v58, %v2185_v34  ;;  %v526_v17 = vperm.slane %v520_v1, %v2185_v34 }
 0x1ba   : > { %v594_v27 = vperm.slane %v588_v24, %v2185_v34  ;;  %v598_v28 = vperm.slane %v590_v25, %v2185_v34  ;;  %v599_v29 = vrot.slane %v582_v20, 4  ;;  %v601_v30 = vrot.slane %v586_v21, 4 }
 0x1bb   : > { %v537_v22 = vrot.slane %v518_v6, 4 }
 0x1bc   : > { %v602_v32 = vsel %vm429_vm1, 0.0, %v601_v30  ;;  %v603_v33 = vrot.slane %v594_v27, 4  ;;  %v605_v35 = vrot.slane %v598_v28, 4  ;;  %v607_v37 = vsel %vm429_vm1, %v601_v30, %v582_v20 }
 0x1bd   : > { %v612_v38 = vrot.slane %v602_v32, 4  ;;  %v600_v41 = vsel %vm429_vm1, 0.0, %v599_v29  ;;  %v611_v43 = vperm.slane %v607_v37, %v2175_v19  ;;  %v535_v28 = vrot.slane %v530_v8, 4 }
 0x1be   : > { %v606_v42 = vsel %vm429_vm1, 0.0, %v605_v35  ;;  %v618_v44 = vsel %vm429_vm1, %v605_v35, %v594_v27  ;;  %v604_v49 = vsel %vm429_vm1, 0.0, %v603_v33  ;;  %v533_v27 = vrot.slane %v514_v10, 4 }
 0x1bf   : > { %v623_v45 = vrot.slane %v606_v42, 4  ;;  %v613_v46 = vsel %vm429_vm1, %v612_v38, %v600_v41  ;;  %v622_v47 = vperm.slane %v618_v44, %v2175_v19  ;;  %v631_v51 = vrot.slane %v611_v43, 4 }
 0x1c0   : > { %v617_v50 = vperm.slane %v613_v46, %v2175_v19  ;;  %v538_v32 = vsel %vm429_vm1, %v530_v8, %v537_v22  ;;  %v531_v33 = vrot.slane %v526_v17, 4  ;;  %v534_v36 = vsel %vm429_vm1, %v526_v17, %v533_v27 }
 0x1c1   : > { %v624_v53 = vsel %vm429_vm1, %v623_v45, %v604_v49  ;;  %v643_v54 = vrot.slane %v622_v47, 4  ;;  %v536_v37 = vsel %vm429_vm1, %v535_v28, %v518_v6  ;;  %v786_v38 = vpack.c.bf16 %v538_v32, %v538_v32 }
 0x1c2   : > { %v628_v55 = vperm.slane %v624_v53, %v2175_v19  ;;  %v632_v56 = vsel %vm429_vm1, %v617_v50, %v631_v51  ;;  %v629_v57 = vrot.slane %v617_v50, 4  ;;  %v532_v39 = vsel %vm429_vm1, %v531_v33, %v514_v10 }
 0x1c3   : > { %v640_v59 = vperm.slane %v632_v56, %v2185_v34  ;;  %v784_v40 = vpack.c.bf16 %v534_v36, %v534_v36  ;;  %v785_v41 = vpack.c.bf16 %v536_v37, %v536_v37  ;;  %v783_v42 = vpack.c.bf16 %v532_v39, %v532_v39 }
 0x1c4   : > { %v644_v62 = vsel %vm429_vm1, %v628_v55, %v643_v54  ;;  %v630_v63 = vsel %vm429_vm1, %v629_v57, %v611_v43  ;;  %v641_v0 = vrot.slane %v628_v55, 4 }
 0x1c5   : > { %v652_v3 = vperm.slane %v644_v62, %v2185_v34  ;;  %v659_v4 = vrot.slane %v640_v59, 4  ;;  %v636_v5 = vperm.slane %v630_v63, %v2185_v34 }
 0x1c6   : > { %v642_v7 = vsel %vm429_vm1, %v641_v0, %v622_v47 }
 0x1c7   : > { %v660_v11 = vsel %vm429_vm1, %v652_v3, %v659_v4  ;;  %v648_v13 = vperm.slane %v642_v7, %v2185_v34  ;;  %v655_v14 = vrot.slane %v636_v5, 4  ;;  %v657_v15 = vrot.slane %v652_v3, 4 }
 0x1c8   : > { %v790_v16 = vpack.c.bf16 %v660_v11, %v660_v11 }
 0x1c9   : > { %v656_v18 = vsel %vm429_vm1, %v648_v13, %v655_v14  ;;  %v658_v20 = vsel %vm429_vm1, %v657_v15, %v640_v59  ;;  %v653_v21 = vrot.slane %v648_v13, 4 }
 0x1ca   : > { %v853_v23 = vsel %vm791_vm2, %v790_v16, 0  ;;  %v788_v24 = vpack.c.bf16 %v656_v18, %v656_v18  ;;  %v789_v25 = vpack.c.bf16 %v658_v20, %v658_v20 }
 0x1cb   : > { %862 = vmatpush.bf16.xpose.msrb.mxu0 %v853_v23  ;;  %v654_v26 = vsel %vm429_vm1, %v653_v21, %v636_v5 }
 0x1cc   : > { %v815_v29 = vsel %vm791_vm2, %v788_v24, 0  ;;  %v834_v30 = vsel %vm791_vm2, %v789_v25, 0  ;;  %v787_v31 = vpack.c.bf16 %v654_v26, %v654_v26 }
 0x1cd   : > { %824 = vmatpush.bf16.xpose.msra.mxu2 %v815_v29  ;;  %843 = vmatpush.bf16.xpose.msra.mxu3 %v834_v30 }
 0x1ce   : > { %v796_v35 = vsel %vm791_vm2, %v787_v31, 0 }
 0x1cf   : > { %805 = vmatpush.bf16.xpose.msra.mxu1 %v796_v35 }
 0x1d2   : > { %1505 = vmatmul.msk.bf16.vlgmr.msrb.gmra.mxu0 %vm791_vm2, %v786_v38 }
 0x1d4   : > { %1503 = vmatmul.msk.bf16.vlgmr.msra.gmra.mxu2 %vm791_vm2, %v784_v40  ;;  %1504 = vmatmul.msk.bf16.vlgmr.msra.gmra.mxu3 %vm791_vm2, %v785_v41 }
 0x1d6   : > { %1502 = vmatmul.msk.bf16.vlgmr.msra.gmra.mxu1 %vm791_vm2, %v783_v42 }
 0x24f   : > { %v864_v43 = vpop.f32.mrf.mxu0 }
 0x250   : > { %v877_v54 = vsel %vm791_vm2, %v864_v43, -inf }
 0x253   : > { %v807_v44 = vpop.f32.mrf.mxu1 }
 0x254   : > { %v868_v45 = vsel %vm791_vm2, %v807_v44, -inf }
 0x255   : > { %869 = vmax.xlane.f32.xlu1 %v868_v45 }
 0x257   : > { %v826_v46 = vpop.f32.mrf.mxu2  ;;  %v845_v47 = vpop.f32.mrf.mxu3 }
 0x258   : > { %v866_v48 = vpop.f32.mrf.mxu0  ;;  %v874_v49 = vsel %vm791_vm2, %v845_v47, -inf  ;;  %v871_v50 = vsel %vm791_vm2, %v826_v46, -inf }
 0x259   : > { %875 = vmax.xlane.f32.xlu2 %v874_v49  ;;  %872 = vmax.xlane.f32.xlu0 %v871_v50 }
 0x25b   : > { %v809_v51 = vpop.f32.mrf.mxu1 }
 0x25f   : > { %v828_v52 = vpop.f32.mrf.mxu2  ;;  %v847_v53 = vpop.f32.mrf.mxu3 }
 0x261   : > { %878 = vmax.xlane.f32.xlu2 %v877_v54 }
 0x26d   : > { %1675 = vrot.lane.b32.xlu0 %v2170_v12, %s1975_s28 }
 0x279   : > { %1670 = vrot.lane.b32.xlu2 %v2167_v9, %s1975_s28 }
 0x2c8   : > { %v870_v61 = vpop.xlane.xlu1 %869 }
 0x2c9   : > { %v880_v1 = vsub.f32 %v807_v44, %v870_v61 }
 0x2cb   : > { %v884_v9 = vmul.f32 1.442695, %v880_v1 }
 0x2cc   : > { %v876_v55 = vpop.xlane.xlu2 %875  ;;  %v873_v56 = vpop.xlane.xlu0 %872 }
 0x2cd   : > { %v882_v57 = vsub.f32 %v845_v47, %v876_v55  ;;  %v881_v59 = vsub.f32 %v826_v46, %v873_v56 }
 0x2cf   : > { %v888_v58 = vmul.f32 1.442695, %v882_v57  ;;  %v886_v60 = vmul.f32 1.442695, %v881_v59 }
 0x2d1   : > { %1680 = vpow2.f32 %v888_v58 }
 0x2d2   : > { %1682 = vpow2.f32 %v886_v60 }
 0x2d4   : > { %v879_v62 = vpop.xlane.xlu2 %878 }
 0x2d5   : > { %v883_v63 = vsub.f32 %v864_v43, %v879_v62 }
 0x2d7   : > { %v2271_v0 = vpop.eup %1680  ;;  %v890_v3 = vmul.f32 1.442695, %v883_v63 }
 0x2d8   : > { %v898_v12 = vsel %vm791_vm2, %v2271_v0, 0.0  ;;  %v2275_v5 = vpop.eup %1682 }
 0x2d9   : > { %1684 = vpow2.f32 %v890_v3  ;;  %899 = vadd.xlane.f32.xlu1 %v898_v12  ;;  %v895_v17 = vsel %vm791_vm2, %v2275_v5, 0.0 }
 0x2da   : > { %1686 = vpow2.f32 %v884_v9 }
 0x2dc   : > { %v1671_v4 = vpop.permute.xlu2 %1670 }
 0x2dd   : > { %v1673_v6 = vunpack.i.h.bf16 %v1671_v4  ;;  %v1672_v7 = vunpack.i.l.bf16 %v1671_v4 }
 0x2df   : > { %v2277_v8 = vpop.eup %1684  ;;  %v687_v10 = vrot.slane %v1673_v6, 4  ;;  %v675_v11 = vrot.slane %v1672_v7, 4  ;;  %v1676_v13 = vpop.permute.xlu0 %1675 }
 0x2e0   : > { %v1678_v14 = vunpack.i.h.bf16 %v1676_v13  ;;  %v1677_v15 = vunpack.i.l.bf16 %v1676_v13  ;;  %v901_v16 = vsel %vm791_vm2, %v2277_v8, 0.0  ;;  %v2289_v27 = vpop.eup %1686 }
 0x2e1   : > { %902 = vadd.xlane.f32.xlu0 %v901_v16  ;;  %896 = vadd.xlane.f32.xlu1 %v895_v17  ;;  %v892_v39 = vsel %vm791_vm2, %v2289_v27, 0.0 }
 0x2e2   : > { %v685_v18 = vrot.slane %v1678_v14, 4  ;;  %v688_v20 = vsel %vm429_vm1, %v1678_v14, %v687_v10  ;;  %v673_v21 = vrot.slane %v1677_v15, 4  ;;  %v676_v22 = vsel %vm429_vm1, %v1677_v15, %v675_v11 }
 0x2e3   : > { %v696_v23 = vperm.slane %v688_v20, %v2175_v19  ;;  %v684_v24 = vperm.slane %v676_v22, %v2175_v19 }
 0x2e4   : > { %v686_v25 = vsel %vm429_vm1, %v685_v18, %v1673_v6  ;;  %v674_v26 = vsel %vm429_vm1, %v673_v21, %v1672_v7 }
 0x2e5   : > { %v692_v28 = vperm.slane %v686_v25, %v2175_v19  ;;  %v709_v29 = vrot.slane %v696_v23, 4  ;;  %v680_v30 = vperm.slane %v674_v26, %v2175_v19  ;;  %v711_v31 = vrot.slane %v684_v24, 4 }
 0x2e7   : > { %v697_v32 = vrot.slane %v692_v28, 4  ;;  %v699_v33 = vrot.slane %v680_v30, 4  ;;  %v710_v35 = vsel %vm429_vm1, %v709_v29, %v684_v24  ;;  %v712_v36 = vsel %vm429_vm1, %v696_v23, %v711_v31 }
 0x2e8   : > { %v716_v37 = vperm.slane %v710_v35, %v2185_v34  ;;  %v720_v38 = vperm.slane %v712_v36, %v2185_v34 }
 0x2e9   : > { %v698_v40 = vsel %vm429_vm1, %v697_v32, %v680_v30  ;;  %v700_v41 = vsel %vm429_vm1, %v692_v28, %v699_v33  ;;  %893 = vadd.xlane.f32.xlu1 %v892_v39 }
 0x2ea   : > { %v704_v42 = vperm.slane %v698_v40, %v2185_v34  ;;  %v708_v43 = vperm.slane %v700_v41, %v2185_v34  ;;  %v725_v44 = vrot.slane %v716_v37, 4  ;;  %v727_v45 = vrot.slane %v720_v38, 4 }
 0x2ec   : > { %v721_v46 = vrot.slane %v704_v42, 4  ;;  %v723_v47 = vrot.slane %v708_v43, 4  ;;  %v728_v48 = vsel %vm429_vm1, 0.0, %v727_v45  ;;  %v740_v49 = vsel %vm429_vm1, %v727_v45, %v716_v37 }
 0x2ed   : > { %v745_v50 = vrot.slane %v728_v48, 4  ;;  %v726_v52 = vsel %vm429_vm1, 0.0, %v725_v44  ;;  %v744_v54 = vperm.slane %v740_v49, %v2175_v19 }
 0x2ee   : > { %v724_v51 = vsel %vm429_vm1, 0.0, %v723_v47  ;;  %v729_v53 = vsel %vm429_vm1, %v723_v47, %v704_v42  ;;  %v722_v58 = vsel %vm429_vm1, 0.0, %v721_v46 }
 0x2ef   : > { %v734_v55 = vrot.slane %v724_v51, 4  ;;  %v733_v56 = vperm.slane %v729_v53, %v2175_v19  ;;  %v746_v57 = vsel %vm429_vm1, %v745_v50, %v726_v52  ;;  %v765_v60 = vrot.slane %v744_v54, 4 }
 0x2f0   : > { %v750_v59 = vperm.slane %v746_v57, %v2175_v19 }
 0x2f1   : > { %v735_v61 = vsel %vm429_vm1, %v734_v55, %v722_v58  ;;  %v753_v62 = vrot.slane %v733_v56, 4 }
 0x2f2   : > { %v739_v63 = vperm.slane %v735_v61, %v2175_v19  ;;  %v766_v1 = vsel %vm429_vm1, %v750_v59, %v765_v60  ;;  %v763_v3 = vrot.slane %v750_v59, 4 }
 0x2f3   : > { %v774_v12 = vperm.slane %v766_v1, %v2185_v34 }
 0x2f4   : > { %v754_v9 = vsel %vm429_vm1, %v739_v63, %v753_v62  ;;  %v751_v4 = vrot.slane %v739_v63, 4  ;;  %v764_v6 = vsel %vm429_vm1, %v763_v3, %v744_v54 }
 0x2f5   : > { %v762_v7 = vperm.slane %v754_v9, %v2185_v34  ;;  %v779_v10 = vrot.slane %v774_v12, 4  ;;  %v770_v11 = vperm.slane %v764_v6, %v2185_v34 }
 0x2f6   : > { %v752_v13 = vsel %vm429_vm1, %v751_v4, %v733_v56 }
 0x2f7   : > { %v780_v14 = vsel %vm429_vm1, %v779_v10, %v762_v7  ;;  %v781_v15 = vrot.slane %v762_v7, 4  ;;  %v758_v16 = vperm.slane %v752_v13, %v2185_v34  ;;  %v775_v17 = vrot.slane %v770_v11, 4 }
 0x2f8   : > { %v970_v18 = vpack.c.bf16 %v780_v14, %v780_v14 }
 0x2f9   : > { %v776_v20 = vsel %vm429_vm1, %v775_v17, %v758_v16  ;;  %v782_v21 = vsel %vm429_vm1, %v774_v12, %v781_v15  ;;  %v777_v22 = vrot.slane %v758_v16, 4 }
 0x2fa   : > { %v1015_v23 = vsel %vm975_vm3, %v970_v18, 0  ;;  %v968_v24 = vpack.c.bf16 %v776_v20, %v776_v20  ;;  %v971_v25 = vpack.c.bf16 %v782_v21, %v782_v21 }
 0x2fb   : > { %1024 = vmatpush.bf16.msrb.mxu3 %v1015_v23  ;;  %v778_v26 = vsel %vm429_vm1, %v770_v11, %v777_v22 }
 0x2fc   : > { %v977_v28 = vsel %vm975_vm3, %v968_v24, 0  ;;  %v1034_v29 = vsel %vm975_vm3, %v971_v25, 0  ;;  %v969_v30 = vpack.c.bf16 %v778_v26, %v778_v26 }
 0x2fd   : > { %986 = vmatpush.bf16.msrb.mxu1 %v977_v28  ;;  %1043 = vmatpush.bf16.msra.mxu0 %v1034_v29 }
 0x2fe   : > { %v996_v31 = vsel %vm975_vm3, %v969_v30, 0 }
 0x2ff   : > { %1005 = vmatpush.bf16.msrb.mxu2 %v996_v31 }
 0x34c   : > { %v900_v32 = vpop.xlane.xlu1 %899 }
 0x34d   : > { %1688 = vrcp.f32 %v900_v32  ;;  %v945_v40 = vand.u32 2147483648, %v900_v32  ;;  %v943_v41 = vand.u32 2147483647, %v900_v32  ;;  %vm939_vm5 = vweird.f32 %v900_v32 }
 0x34f   : > { %v946_v45 = vor.u32 1.1754944e-38, %v945_v40  ;;  %vm944_vm7 = vcmp.eq.f32.partialorder %v943_v41, 8.507059e+37 }
 0x353   : > { %v1689_v33 = vpop.eup %1688 }
 0x354   : > { %v935_v35 = vmul.f32 %v1689_v33, %v900_v32  ;;  %v903_v36 = vpop.xlane.xlu0 %902  ;;  %v897_v37 = vpop.xlane.xlu1 %896  ;;  %vm940_vm4 = vweird.f32 %v1689_v33 }
 0x355   : > { %1690 = vrcp.f32 %v903_v36  ;;  %vm941_vm6 = vmor %vm939_vm5, %vm940_vm4  ;;  %v960_v52 = vand.u32 2147483648, %v903_v36  ;;  %v958_v56 = vand.u32 2147483647, %v903_v36  ;;  %v930_v57 = vand.u32 2147483648, %v897_v37 }
 0x356   : > { %v936_v38 = vsub.f32 1.0, %v935_v35  ;;  %1692 = vrcp.f32 %v897_v37  ;;  %v928_v59 = vand.u32 2147483647, %v897_v37  ;;  %vm954_vm10 = vweird.f32 %v903_v36 }
 0x357   : > { %v961_v63 = vor.u32 1.1754944e-38, %v960_v52  ;;  %vm924_vm12 = vweird.f32 %v897_v37  ;;  %vm959_vm13 = vcmp.eq.f32.partialorder %v958_v56, 8.507059e+37 }
 0x358   : > { %v937_v39 = vmul.f32 %v1689_v33, %v936_v38  ;;  %vm929_vm15 = vcmp.eq.f32.partialorder %v928_v59, 8.507059e+37 }
 0x35a   : > { %v938_v42 = vadd.f32 %v1689_v33, %v937_v39 }
 0x35b   : > { %v1691_v43 = vpop.eup %1690 }
 0x35c   : > { %v1693_v44 = vpop.eup %1692  ;;  %v950_v46 = vmul.f32 %v1691_v43, %v903_v36  ;;  %v894_v47 = vpop.xlane.xlu1 %893  ;;  %v942_v48 = vsel %vm941_vm6, %v1689_v33, %v938_v42  ;;  %vm955_vm8 = vweird.f32 %v1691_v43 }
 0x35d   : > { %v920_v49 = vmul.f32 %v1693_v44, %v897_v37  ;;  %1694 = vrcp.f32 %v894_v47  ;;  %v947_v51 = vsel %vm944_vm7, %v946_v45, %v942_v48  ;;  %vm925_vm9 = vweird.f32 %v1693_v44  ;;  %vm956_vm11 = vmor %vm954_vm10, %vm955_vm8 }
 0x35e   : > { %v951_v50 = vsub.f32 1.0, %v950_v46  ;;  %v948_v54 = vmul.f32 %v2271_v0, %v947_v51  ;;  %vm926_vm14 = vmor %vm924_vm12, %vm925_vm9  ;;  %v931_v0 = vor.u32 1.1754944e-38, %v930_v57  ;;  %v915_v11 = vand.u32 2147483648, %v894_v47 }
 0x35f   : > { %v921_v53 = vsub.f32 1.0, %v920_v49  ;;  %v913_v15 = vand.u32 2147483647, %v894_v47  ;;  %vm909_vm4 = vweird.f32 %v894_v47  ;;  %vm1172_vm7 = vcmask 130048  }
 0x360   : > { %v952_v55 = vmul.f32 %v1691_v43, %v951_v50  ;;  %v966_v60 = vpack.c.bf16 %v948_v54, %v948_v54  ;;  %v916_v20 = vor.u32 1.1754944e-38, %v915_v11  ;;  %vm1174_vm8 = vcmask 195584  }
 0x361   : > { %v922_v58 = vmul.f32 %v1693_v44, %v921_v53  ;;  %vm914_vm6 = vcmp.eq.f32.partialorder %v913_v15, 8.507059e+37 }
 0x362   : > { %v953_v61 = vadd.f32 %v1691_v43, %v952_v55  ;;  %1508 = vmatmul.msk.bf16.vlgmr.msrb.gmra.mxu3 %vm791_vm2, %v966_v60 }
 0x363   : > { %v1695_v62 = vpop.eup %1694  ;;  %v923_v1 = vadd.f32 %v1693_v44, %v922_v58 }
 0x364   : > { %v957_v3 = vsel %vm956_vm11, %v1691_v43, %v953_v61  ;;  %v905_v12 = vmul.f32 %v1695_v62, %v894_v47  ;;  %vm910_vm3 = vweird.f32 %v1695_v62 }
 0x365   : > { %v962_v9 = vsel %vm959_vm13, %v961_v63, %v957_v3  ;;  %v927_v4 = vsel %vm926_vm14, %v1693_v44, %v923_v1  ;;  %vm911_vm5 = vmor %vm909_vm4, %vm910_vm3 }
 0x366   : > { %v963_v6 = vmul.f32 %v2277_v8, %v962_v9  ;;  %v906_v7 = vsub.f32 1.0, %v905_v12  ;;  %v932_v10 = vsel %vm929_vm15, %v931_v0, %v927_v4 }
 0x367   : > { %v933_v13 = vmul.f32 %v2275_v5, %v932_v10 }
 0x368   : > { %v907_v14 = vmul.f32 %v1695_v62, %v906_v7  ;;  %v967_v16 = vpack.c.bf16 %v963_v6, %v963_v6 }
 0x369   : > { %v965_v17 = vpack.c.bf16 %v933_v13, %v933_v13 }
 0x36a   : > { %v908_v18 = vadd.f32 %v1695_v62, %v907_v14  ;;  %1509 = vmatmul.msk.bf16.vlgmr.msra.gmra.mxu0 %vm791_vm2, %v967_v16 }
 0x36b   : > { %1507 = vmatmul.msk.bf16.vlgmr.msrb.gmra.mxu2 %vm791_vm2, %v965_v17 }
 0x36c   : > { %v912_v8 = vsel %vm911_vm5, %v1695_v62, %v908_v18 }
 0x36d   : > { %v917_v21 = vsel %vm914_vm6, %v916_v20, %v912_v8 }
 0x36e   : > { %v918_v22 = vmul.f32 %v2289_v27, %v917_v21 }
 0x370   : > { %v964_v23 = vpack.c.bf16 %v918_v22, %v918_v22 }
 0x372   : > { %1506 = vmatmul.msk.bf16.vlgmr.msrb.gmra.mxu1 %vm791_vm2, %v964_v23 }
 0x3e5   : > { %v1026_v5 = vpop.f32.mrf.mxu3 }
 0x3e6   : > { %v1049_v26 = vrot.slane %v1026_v5, 4 }
 0x3e7   : > { %v1045_v24 = vpop.f32.mrf.mxu0 }
 0x3e8   : > { %v1061_v25 = vrot.slane %v1045_v24, 4 }
 0x3ed   : > { %v1028_v29 = vpop.f32.mrf.mxu3 }
 0x3ee   : > { %v1007_v28 = vpop.f32.mrf.mxu2 }
 0x3ef   : > { %v1062_v30 = vsel %vm429_vm1, %v1061_v25, %v1007_v28  ;;  %v1063_v31 = vrot.slane %v1007_v28, 4  ;;  %v988_v32 = vpop.f32.mrf.mxu1  ;;  %v1047_v33 = vpop.f32.mrf.mxu0 }
 0x3f0   : > { %v1068_v35 = vperm.slane %v1062_v30, %v2175_v19  ;;  %v1050_v36 = vsel %vm429_vm1, %v1049_v26, %v988_v32  ;;  %v1051_v37 = vrot.slane %v988_v32, 4  ;;  %v1544_v32 = vld [vmem:[#allocation7 + $0x8] sm:$0xff] }
 0x3f1   : > { %v1064_v27 = vsel %vm429_vm1, %v1045_v24, %v1063_v31  ;;  %v1056_v38 = vperm.slane %v1050_v36, %v2175_v19  ;;  %1203 = vmatpush.bf16.msra.mxu1 %v1544_v32 }
 0x3f2   : > { %v1072_v39 = vperm.slane %v1064_v27, %v2175_v19  ;;  %v1073_v40 = vrot.slane %v1068_v35, 4  ;;  %v1052_v41 = vsel %vm429_vm1, %v1026_v5, %v1051_v37 }
 0x3f3   : > { %v1060_v42 = vperm.slane %v1052_v41, %v2175_v19  ;;  %v1075_v43 = vrot.slane %v1056_v38, 4 }
 0x3f4   : > { %v1085_v44 = vrot.slane %v1072_v39, 4  ;;  %v1074_v45 = vsel %vm429_vm1, %v1073_v40, %v1056_v38  ;;  %v2381_v40 = vld [vmem:[#allocation11] sm:$0xff] }
 0x3f5   : > { %v1076_v46 = vsel %vm429_vm1, %v1068_v35, %v1075_v43  ;;  %v1080_v47 = vperm.slane %v1074_v45, %v2185_v34  ;;  %v1087_v48 = vrot.slane %v1060_v42, 4  ;;  %v1181_v41 = vperm.slane %v2381_v40, 0 }
 0x3f6   : > { %v1084_v49 = vperm.slane %v1076_v46, %v2185_v34  ;;  %v1086_v50 = vsel %vm429_vm1, %v1085_v44, %v1060_v42  ;;  %v1009_v51 = vpop.f32.mrf.mxu2 }
 0x3f7   : > { %v1088_v52 = vsel %vm429_vm1, %v1072_v39, %v1087_v48  ;;  %v1092_v53 = vperm.slane %v1086_v50, %v2185_v34  ;;  %v990_v54 = vpop.f32.mrf.mxu1  ;;  %v1097_v56 = vrot.slane %v1080_v47, 4 }
 0x3f8   : > { %v1096_v55 = vperm.slane %v1088_v52, %v2185_v34  ;;  %v1099_v57 = vrot.slane %v1084_v49, 4 }
 0x3f9   : > { %v1101_v59 = vrot.slane %v1092_v53, 4  ;;  %v1098_v1 = vsel %vm429_vm1, 0.0, %v1097_v56 }
 0x3fa   : > { %v1100_v58 = vsel %vm429_vm1, 0.0, %v1099_v57  ;;  %v1103_v60 = vrot.slane %v1096_v55, 4  ;;  %v1105_v61 = vsel %vm429_vm1, %v1099_v57, %v1080_v47  ;;  %v1979_v47 = vmov 32.0  }
 0x3fb   : > { %v1110_v62 = vrot.slane %v1100_v58, 4  ;;  %v1109_v63 = vperm.slane %v1105_v61, %v2175_v19  ;;  %v1102_v6 = vsel %vm429_vm1, 0.0, %v1101_v59  ;;  %1696 = vrcp.f32 %v1979_v47  ;;  %v1545_v59 = vld [vmem:[#allocation8] sm:$0xff] }
 0x3fc   : > { %v1104_v3 = vsel %vm429_vm1, 0.0, %v1103_v60  ;;  %v1116_v0 = vsel %vm429_vm1, %v1103_v60, %v1092_v53  ;;  %v1548_v60 = vld [vmem:[#allocation10 + $0x8] sm:$0xff] }
 0x3fd   : > { %v1121_v12 = vrot.slane %v1104_v3, 4  ;;  %v1111_v9 = vsel %vm429_vm1, %v1110_v62, %v1098_v1  ;;  %v1120_v4 = vperm.slane %v1116_v0, %v2175_v19  ;;  %v1129_v10 = vrot.slane %v1109_v63, 4  ;;  %1306 = vmatpush.bf16.msra.mxu3 %v1548_v60 }
 0x3fe   : > { %v1115_v7 = vperm.slane %v1111_v9, %v2175_v19 }
 0x3ff   : > { %v1122_v11 = vsel %vm429_vm1, %v1121_v12, %v1102_v6  ;;  %v1141_v13 = vrot.slane %v1120_v4, 4 }
 0x400   : > { %v1126_v14 = vperm.slane %v1122_v11, %v2175_v19  ;;  %v1127_v15 = vrot.slane %v1115_v7, 4  ;;  %v1130_v16 = vsel %vm429_vm1, %v1115_v7, %v1129_v10  ;;  %v1240_v7 = vperm.slane %v2381_v40, 3 }
 0x401   : > { %v1138_v23 = vperm.slane %v1130_v16, %v2185_v34  ;;  %v1697_v48 = vpop.eup %1696  ;;  %v1242_v11 = vperm.slane %v2381_v40, 4 }
 0x402   : > { %v1142_v17 = vsel %vm429_vm1, %v1126_v14, %v1141_v13  ;;  %v1128_v18 = vsel %vm429_vm1, %v1127_v15, %v1109_v63  ;;  %v1139_v20 = vrot.slane %v1126_v14, 4  ;;  %v1215_v49 = vmul.f32 32.0, %v1697_v48  ;;  %v1547_v63 = vld [vmem:[#allocation10] sm:$0xff] }
 0x403   : > { %v1150_v8 = vperm.slane %v1142_v17, %v2185_v34  ;;  %v1134_v21 = vperm.slane %v1128_v18, %v2185_v34  ;;  %v1157_v30 = vrot.slane %v1138_v23, 4  ;;  %1307 = vmatpush.bf16.msra.mxu3 %v1547_v63  ;;  %v1249_v17 = vperm.slane %v2381_v40, 1 }
 0x404   : > { %v1140_v22 = vsel %vm429_vm1, %v1139_v20, %v1120_v4  ;;  %v1216_v50 = vsub.f32 1.0, %v1215_v49 }
 0x405   : > { %v1155_v5 = vrot.slane %v1150_v8, 4  ;;  %v1146_v24 = vperm.slane %v1140_v22, %v2185_v34  ;;  %v1153_v19 = vrot.slane %v1134_v21, 4  ;;  %v1158_v31 = vsel %vm429_vm1, %v1150_v8, %v1157_v30  ;;  %v1543_v34 = vld [vmem:[#allocation7] sm:$0xff] }
 0x406   : > { %1204 = vmatpush.bf16.msra.mxu1 %v1543_v34  ;;  %v1217_v51 = vmul.f32 %v1697_v48, %v1216_v50 }
 0x407   : > { %v1156_v25 = vsel %vm429_vm1, %v1155_v5, %v1138_v23  ;;  %v1151_v26 = vrot.slane %v1146_v24, 4  ;;  %v1154_v28 = vsel %vm429_vm1, %v1146_v24, %v1153_v19  ;;  %v1284_v23 = vperm.slane %v2381_v40, 2 }
 0x408   : > { %1164 = vrot.lane.b32.xlu1 %v1156_v25, %s1976_s11  ;;  %1160 = vrot.lane.b32.xlu2 %v1154_v28, %s1977_s12  ;;  %v1218_v52 = vadd.f32 %v1697_v48, %v1217_v51 }
 0x409   : > { %v1152_v29 = vsel %vm429_vm1, %v1151_v26, %v1134_v21  ;;  %vm1219_vm1 = vweird.f32 %v1697_v48 }
 0x40a   : > { %v1220_v53 = vsel %vm1219_vm1, %v1697_v48, %v1218_v52 }
 0x410   : > { %1168 = vrot.lane.b32.xlu2 %v1158_v31, %s1978_s13 }
 0x462   : > { %v1161_v33 = vpop.permute.xlu2 %1160 }
 0x463   : > { %v1171_v35 = vsel %vm791_vm2, %v1152_v29, %v1161_v33 }
 0x46a   : > { %v1169_v37 = vpop.permute.xlu2 %1168 }
 0x47a   : > { %v1165_v36 = vpop.permute.xlu1 %1164 }
 0x47b   : > { %v1173_v27 = vsel %vm1172_vm7, %v1171_v35, %v1165_v36 }
 0x47c   : > { %v1175_v38 = vsel %vm1174_vm8, %v1173_v27, %v1169_v37 }
 0x47d   : > { %v1176_v39 = vpack.c.bf16 %v1175_v38, %v1175_v38 }
 0x47f   : > { %1518 = vmatmul.msk.bf16.vlgmr.msra.gmra.mxu1 %vm401_vm0, %v1176_v39 }
 0x4fc   : > { %v1206_v42 = vpop.f32.mrf.mxu1 }
 0x4fd   : > { %v1207_v43 = vadd.f32 %v1206_v42, %v1181_v41  ;;  %v1336_v42 = vperm.slane %v2381_v40, 5 }
 0x4ff   : > { %v1210_v44 = vadd.f32 %v1207_v43, %v2159_v2  ;;  %v1546_v2 = vld [vmem:[#allocation8 + $0x8] sm:$0xff] }
 0x500   : > { %1271 = vmatpush.bf16.msra.mxu2 %v1546_v2 }
 0x501   : > { %v1211_v45 = vsel %vm401_vm0, %v1210_v44, 0.0 }
 0x502   : > { %1212 = vadd.xlane.f32.xlu2 %v1211_v45  ;;  %v1338_v45 = vperm.slane %v2381_v40, 6 }
 0x504   : > { %v1208_v46 = vpop.f32.mrf.mxu1  ;;  %1272 = vmatpush.bf16.msra.mxu2 %v1545_v59 }
 0x575   : > { %v1213_v54 = vpop.xlane.xlu2 %1212 }
 0x576   : > { %v1221_v55 = vmul.f32 %v1220_v53, %v1213_v54 }
 0x578   : > { %v1222_v56 = vsub.f32 %v1210_v44, %v1221_v55 }
 0x57a   : > { %v1223_v57 = vmul.f32 %v1222_v56, %v1222_v56 }
 0x57c   : > { %v1224_v58 = vsel %vm401_vm0, %v1223_v57, 0.0 }
 0x57d   : > { %1225 = vadd.xlane.f32.xlu1 %v1224_v58 }
 0x5f0   : > { %v1226_v61 = vpop.xlane.xlu1 %1225 }
 0x5f1   : > { %v1227_v62 = vmul.f32 %v1226_v61, %v1220_v53 }
 0x5f3   : > { %v1228_v1 = vadd.f32 1e-05, %v1227_v62 }
 0x5f5   : > { %1698 = vrsqrt.f32 %v1228_v1  ;;  %vm1235_vm9 = vweird.f32 %v1228_v1 }
 0x5fb   : > { %v1699_v3 = vpop.eup %1698 }
 0x5fc   : > { %v1230_v0 = vmul.f32 %v1699_v3, %v1228_v1  ;;  %vm1236_vm2 = vweird.f32 %v1699_v3 }
 0x5fd   : > { %vm1237_vm10 = vmor %vm1235_vm9, %vm1236_vm2 }
 0x5fe   : > { %v1231_v12 = vmul.f32 %v1699_v3, %v1230_v0 }
 0x600   : > { %v1232_v9 = vmul.f32 0.5, %v1231_v12 }
 0x602   : > { %v1233_v4 = vsub.f32 1.5, %v1232_v9 }
 0x604   : > { %v1234_v6 = vmul.f32 %v1699_v3, %v1233_v4 }
 0x606   : > { %v1238_v10 = vsel %vm1237_vm10, %v1699_v3, %v1234_v6 }
 0x607   : > { %v1239_v13 = vmul.f32 %v1238_v10, %v1222_v56 }
 0x609   : > { %v1241_v14 = vmul.f32 %v1240_v7, %v1239_v13 }
 0x60b   : > { %v1243_v15 = vadd.f32 %v1242_v11, %v1241_v14 }
 0x60d   : > { %v1244_v16 = vpack.c.bf16 %v1243_v15, %v1243_v15 }
 0x60f   : > { %1527 = vmatmul.msk.bf16.vlgmr.msra.gmra.mxu2 %vm401_vm0, %v1244_v16 }
 0x692   : > { %v1274_v18 = vpop.f32.mrf.mxu2 }
 0x693   : > { %v1275_v20 = vadd.f32 %v1274_v18, %v1249_v17 }
 0x695   : > { %v1278_v8 = vmax.f32 %v1275_v20, 0.0 }
 0x697   : > { %v1279_v21 = vpack.c.bf16 %v1278_v8, %v1278_v8 }
 0x699   : > { %1536 = vmatmul.msk.bf16.vlgmr.msra.gmra.mxu3 %vm401_vm0, %v1279_v21 }
 0x69a   : > { %v1276_v22 = vpop.f32.mrf.mxu2 }
 0x71c   : > { %v1309_v5 = vpop.f32.mrf.mxu3 }
 0x71d   : > { %v1310_v24 = vadd.f32 %v1309_v5, %v1284_v23 }
 0x71f   : > { %v1313_v19 = vadd.f32 %v1310_v24, %v1243_v15 }
 0x721   : > { %v1314_v25 = vsel %vm401_vm0, %v1313_v19, 0.0 }
 0x722   : > { %1315 = vadd.xlane.f32.xlu0 %v1314_v25 }
 0x724   : > { %v1311_v26 = vpop.f32.mrf.mxu3 }
 0x795   : > { %v1316_v28 = vpop.xlane.xlu0 %1315 }
 0x796   : > { %v1317_v29 = vmul.f32 %v1316_v28, %v1220_v53 }
 0x798   : > { %v1318_v30 = vsub.f32 %v1313_v19, %v1317_v29 }
 0x79a   : > { %v1319_v31 = vmul.f32 %v1318_v30, %v1318_v30 }
 0x79c   : > { %v1320_v32 = vsel %vm401_vm0, %v1319_v31, 0.0 }
 0x79d   : > { %1321 = vadd.xlane.f32.xlu0 %v1320_v32 }
 0x810   : > { %v1322_v34 = vpop.xlane.xlu0 %1321 }
 0x811   : > { %v1323_v33 = vmul.f32 %v1322_v34, %v1220_v53 }
 0x813   : > { %v1324_v35 = vadd.f32 1e-05, %v1323_v33 }
 0x815   : > { %1700 = vrsqrt.f32 %v1324_v35  ;;  %vm1331_vm12 = vweird.f32 %v1324_v35 }
 0x81b   : > { %v1701_v36 = vpop.eup %1700 }
 0x81c   : > { %v1326_v37 = vmul.f32 %v1701_v36, %v1324_v35  ;;  %vm1332_vm11 = vweird.f32 %v1701_v36 }
 0x81d   : > { %vm1333_vm13 = vmor %vm1331_vm12, %vm1332_vm11 }
 0x81e   : > { %v1327_v27 = vmul.f32 %v1701_v36, %v1326_v37 }
 0x820   : > { %v1328_v38 = vmul.f32 0.5, %v1327_v27 }
 0x822   : > { %v1329_v39 = vsub.f32 1.5, %v1328_v38 }
 0x824   : > { %v1330_v41 = vmul.f32 %v1701_v36, %v1329_v39 }
 0x826   : > { %v1334_v43 = vsel %vm1333_vm13, %v1701_v36, %v1330_v41 }
 0x827   : > { %v1335_v44 = vmul.f32 %v1334_v43, %v1318_v30 }
 0x829   : > { %v1337_v46 = vmul.f32 %v1336_v42, %v1335_v44 }
 0x82b   : > { %v1339_v47 = vadd.f32 %v1338_v45, %v1337_v46 }
 0x82d   : > { %1340 = vst.msk [vmem:[%s376_s15] sm:$0xff] %vm401_vm0, %v1339_v47 }
 0x82e   : > { %1909 = shalt.err (!%p1906_p9)
}
 0x82f   : > { %1571 = dma.vmem_to_hbm [thread:$0]  (%p2106_p13), %s1355_s16, 128, %s1357_s19, %s1342_s8  }
 0x830 PF: > { %s1368_s29 = sand.u32 1, %s1948_s24   ;;  %p2449_p10 = scmp.ge.s32.totalorder %s1960_s27, 2 }
 0x831   : > { %s1369_s14 = scalar_lea.sflag [#allocation4], %s1368_s29 }
 0x832   : > { %p1594_p11 = pnand %p2449_p10, %p2111_p4 }
 0x834   : > { %p1595_p0 = pneg %p1594_p11 }
 0x836   : > { %1943 = dma.done.wait (%p1595_p0), %s1369_s14, 128  }
 0x837   : > { %1945 = vsyncadd (%p1595_p0), %s1369_s14, 4294967168  ;;  %p23_p2 = scmp.ge.s32.totalorder %s2086_s20, 4   ;;  %s2450_s24 = smov %s1952_s25 }
 0x838   : > { %s2451_s25 = smov %s1956_s26  ;;  %s2452_s26 = smov %s2098_s21 }
 0x839   : > { %s2453_s27 = smov %s2086_s20  ;;  %25 = sbr.rel (!%p23_p2) target bundleno = 10 (0xa), region = 113 }
 0x83e   :  { %1375 = vsyncpa [#allocation3], 1 }
 0x83f   :  { %1377 = vsyncpa [#allocation3 + $0x1], 1 }
 0x840   :  { %1378 = vsyncpa [#allocation6], 1 }
 0x841   :  { %1379 = vsyncpa [#allocation9], 1 }
 0x842   :  { %1380 = vsyncpa [#allocation12], 1 }
 0x843   :  { %1381 = vsyncpa [#allocation4], 1 }
 0x844   :  { %1383 = vsyncpa [#allocation4 + $0x1], 1 }

</bundles_post_ra>
